<compile_context>
chip_gen: v7x
topology: tpu7x:2x2x1
jax: 0.10.0
libtpu: 0.0.40
codegen_flags: <defaults>
</compile_context>

<pallas_src>
import functools

import jax
import jax.numpy as jnp
import numpy as np
from jax.experimental import pallas as pl
from jax.experimental.pallas import tpu as pltpu


def _axis_plan(in_size, out_size, stride, pad, K):
    """Sub-pixel tap plan for one spatial axis of a ConvTranspose.

    For output position o = r*stride + phase the contributing kernel taps are
    k = (phase+pad) % stride + t*stride (< K) and the input index is
    i = r + (phase+pad)//stride - t.

    Returns (P, padlo, max_a, taps) where
      P      : phase-rows computed per phase (= ceil(out_size/stride))
      padlo  : low-side zero padding of the input axis
      max_a  : largest padded tap offset
      taps   : per-phase list of (k, a); tap k reads padded index r + a.
    """
    P = -(-out_size // stride)
    raw, padlo = [], 0
    for ph in range(stride):
        r = (ph + pad) % stride
        q = (ph + pad) // stride
        taps, k, t = [], r, 0
        while k < K:
            taps.append((k, q - t))
            t += 1
            k += stride
        raw.append(taps)
        if taps:
            padlo = max(padlo, -min(a for _, a in taps))
    taps = [[(k, a + padlo) for (k, a) in tl] for tl in raw]
    max_a = max((a for tl in taps for _, a in tl), default=0)
    return P, padlo, max_a, taps


def _pick_batch_block(N, per_batch_bytes, *, budget=8 << 20, min_grid=2):
    """Largest batch block that divides N, fits a per-step VMEM budget and
    keeps >= min(min_grid, N) grid steps (so v7x's two TensorCores get work)."""
    best = 1
    for b in range(1, N + 1):
        if N % b:
            continue
        if b * per_batch_bytes > budget:
            break
        if N // b < min(min_grid, N):
            break
        best = b
    return best


def _vmem_limit_bytes(step_bytes):
    """Generation-aware scoped-VMEM budget (v7x has only 64 MiB physical)."""
    try:
        kind = jax.devices()[0].device_kind.lower()
    except Exception:
        kind = ""
    cap = (48 << 20) if ("v7" in kind or "tpu7" in kind) else (96 << 20)
    need = 4 * step_bytes + (8 << 20)   # ~double-buffered blocks + headroom
    return int(min(max(need, 32 << 20), cap))


def _decoder_kernel(x_ref, w_ref, b_ref, o_ref, *, shifts, L, B_blk, act):
    """One batch block per grid step; all phases/taps in a single MXU matmul.

    x_ref: (B_blk, Cin, HWpad)          padded, flattened, compute-dtype input
    w_ref: (n_phase*Cout, n_shift*Cin)  dense consolidated LHS (compute dtype)
    b_ref: (n_phase*Cout, 1)            float32 bias, phase-tiled
    o_ref: (1, n_phase*Cout, B_blk*L)   lane-dense output block
    """
    # Stack the distinct shifted windows along sublanes (contraction rows) and
    # the batch block along (128-aligned) lanes -> one RHS, one matmul.
    rhs = jnp.concatenate(
        [jnp.concatenate([x_ref[b, :, sh:sh + L] for sh in shifts], axis=0)
         for b in range(B_blk)],
        axis=1)
    acc = jax.lax.dot_general(w_ref[...], rhs, (((1,), (0,)), ((), ())),
                              preferred_element_type=jnp.float32)
    acc = acc + b_ref[...]                       # single bias add (epilogue)
    if act == 'relu':
        acc = jnp.maximum(acc, 0.0)
    elif act == 'sigmoid':
        acc = jax.nn.sigmoid(acc)
    # else: identity
    o_ref[0] = acc.astype(o_ref.dtype)


def decoder_block(x_nchw, weight, bias, *, stride, padding=1, out_padding=1,
                  act='relu', compute_dtype=jnp.bfloat16):
    """Equivalent of Decoder_block.forward(x): ConvTranspose2d + activation.

    x_nchw : (N, Cin, H, W)
    weight : (Cin, Cout, K, K)   PyTorch ConvTranspose2d weight layout
    bias   : (Cout,)
    compute_dtype : matmul-input dtype (accumulation is always float32).
        Default bfloat16 (full-rate MXU on v5e/v6e/v7x); pass jnp.float32 for
        bit-accurate full precision.
    """
    N, Cin, H, W = x_nchw.shape
    _, Cout, K, _ = weight.shape
    s, p, op = stride, padding, out_padding
    out_dtype = x_nchw.dtype
    cdt = np.dtype(compute_dtype) if compute_dtype is not None else np.dtype(out_dtype)

    Hout = (H - 1) * s - 2 * p + K + op
    Wout = (W - 1) * s - 2 * p + K + op

    # Per-axis sub-pixel plans (all static Python ints).
    Hp, padlo_y, max_ay, taps_y = _axis_plan(H, Hout, s, p, K)
    Wp, padlo_x, max_ax, taps_x = _axis_plan(W, Wout, s, p, K)

    # Padded widths.  Wpad is bumped so L = Hp*Wpad is a multiple of 128
    # (unmasked lane-dense stores); the bump is capped so degenerate Hp values
    # cannot blow up the lane width.
    Wpad_min = max(W + padlo_x, max_ax + Wp, max_ax + 1)
    Wpad = Wpad_min
    while (Hp * Wpad) % 128 != 0 and Wpad < Wpad_min + 128:
        Wpad += 1
    if (Hp * Wpad) % 128 != 0:
        Wpad = Wpad_min                # fall back to masked stores, no blow-up
    # Hpad guarantees every flattened window (length L at any shift) stays
    # inside the per-image buffer.
    Hpad = max(H + padlo_y, max_ay + Hp + (1 if max_ax > 0 else 0))
    L = Hp * Wpad
    HWpad = Hpad * Wpad
    n_phase = s * s

    # Distinct flat shift offsets actually used by any phase.
    used = set()
    for py in range(s):
        for px in range(s):
            for _, ay in taps_y[py]:
                for _, ax in taps_x[px]:
                    used.add((ay, ax))
    shift_pairs = sorted(used)
    shift_idx = {pr: i for i, pr in enumerate(shift_pairs)}
    shifts = tuple(ay * Wpad + ax for (ay, ax) in shift_pairs)
    n_shift = len(shifts)

    # Trace-time bound checks for the flattened-window trick (covers
    # non-default stride/K/padding/out_padding combinations).
    assert max_ax < Wpad and Wp + max_ax <= Wpad and Hp + max_ay <= Hpad
    assert all(0 <= sh and sh + L <= HWpad for sh in shifts)

    # Dense consolidated LHS: (n_phase*Cout, n_shift*Cin), zero where a tap
    # does not apply.  Built once at trace time.
    M = n_phase * Cout
    w_dense = jnp.zeros((M, n_shift * Cin), jnp.float32)
    for py in range(s):
        for px in range(s):
            ph = py * s + px
            for (ky, ay) in taps_y[py]:
                for (kx, ax) in taps_x[px]:
                    si = shift_idx[(ay, ax)]
                    w_dense = w_dense.at[ph * Cout:(ph + 1) * Cout,
                                         si * Cin:(si + 1) * Cin].add(
                        weight[:, :, ky, kx].astype(jnp.float32).T)
    w_lhs = w_dense.astype(cdt)
    b2 = jnp.tile(bias.astype(jnp.float32), (n_phase,)).reshape(M, 1)

    # Single small pad of the *undilated* input + cast to the compute dtype
    # (hoisted out of the kernel; halves the input DMA for bf16).
    x_pad = jnp.pad(x_nchw, ((0, 0), (0, 0),
                             (padlo_y, Hpad - H - padlo_y),
                             (padlo_x, Wpad - W - padlo_x)))
    x_flat = x_pad.reshape(N, Cin, HWpad).astype(cdt)

    # Batch blocking: amortize per-grid-step overhead while keeping >=2 grid
    # steps when N >= 2 so both v7x TensorCores have work.
    per_batch_bytes = (Cin * HWpad * cdt.itemsize
                       + M * L * np.dtype(out_dtype).itemsize)
    B_blk = _pick_batch_block(N, per_batch_bytes)
    G = N // B_blk
    step_bytes = B_blk * per_batch_bytes + M * n_shift * Cin * cdt.itemsize

    kernel = functools.partial(_decoder_kernel, shifts=shifts, L=L,
                               B_blk=B_blk, act=act)
    out_flat = pl.pallas_call(
        kernel,
        out_shape=jax.ShapeDtypeStruct((G, M, B_blk * L), out_dtype),
        grid=(G,),
        in_specs=[
            pl.BlockSpec((B_blk, Cin, HWpad), lambda g: (g, 0, 0)),
            pl.BlockSpec((M, n_shift * Cin), lambda g: (0, 0)),
            pl.BlockSpec((M, 1), lambda g: (0, 0)),
        ],
        out_specs=pl.BlockSpec((1, M, B_blk * L), lambda g: (g, 0, 0)),
        compiler_params=pltpu.CompilerParams(
            dimension_semantics=("parallel",),
            vmem_limit_bytes=_vmem_limit_bytes(step_bytes)),
    )(x_flat, w_lhs, b2)

    # Interleave the s*s phases / un-flatten batch -> NCHW (one fused XLA pass).
    r = out_flat.reshape(G, s, s, Cout, B_blk, Hp, Wpad)[..., :Wp]
    r = jnp.transpose(r, (0, 4, 3, 5, 1, 6, 2))          # (G,B,C,Hp,s,Wp,s)
    r = r.reshape(N, Cout, Hp * s, Wp * s)
    return r[:, :, :Hout, :Wout]


def _conv_transpose_ref(x, w, b, stride, padding, out_padding):
    """Straight-from-the-definition numpy reference (PyTorch semantics + ReLU)."""
    N, Cin, H, W = x.shape
    _, Cout, K, _ = w.shape
    Hout = (H - 1) * stride - 2 * padding + K + out_padding
    Wout = (W - 1) * stride - 2 * padding + K + out_padding
    out = np.zeros((N, Cout, Hout, Wout), np.float32)
    for iy in range(H):
        for ix in range(W):
            for ky in range(K):
                for kx in range(K):
                    oy = iy * stride - padding + ky
                    ox = ix * stride - padding + kx
                    if 0 <= oy < Hout and 0 <= ox < Wout:
                        out[:, :, oy, ox] += x[:, :, iy, ix] @ w[:, :, ky, kx]
    out += b[None, :, None, None]
    return np.maximum(out, 0.0)


if __name__ == "__main__":
    # Decoder_block(in_channel=4, out_channel=8, kernel=3, stride=2,
    #               padding=1, out_padding=1, act='relu')
    N, Cin, H, W = 2, 4, 16, 16
    Cout, K, stride, padding, out_padding = 8, 3, 2, 1, 1

    key = jax.random.PRNGKey(0)
    kx, kw, kb = jax.random.split(key, 3)
    x = jax.random.normal(kx, (N, Cin, H, W), dtype=jnp.float32)
    bound = 1.0 / np.sqrt(Cin * K * K)
    weight = jax.random.uniform(kw, (Cin, Cout, K, K), jnp.float32,
                                minval=-bound, maxval=bound)
    bias = jax.random.uniform(kb, (Cout,), jnp.float32,
                              minval=-bound, maxval=bound)

    # (1) Full-precision path: exact ConvTranspose2d + ReLU semantics.
    out_f32 = jax.block_until_ready(
        decoder_block(x, weight, bias, stride=stride, padding=padding,
                      out_padding=out_padding, act='relu',
                      compute_dtype=jnp.float32))
    ref = _conv_transpose_ref(np.asarray(x), np.asarray(weight),
                              np.asarray(bias), stride, padding, out_padding)
    np.testing.assert_allclose(np.asarray(out_f32), ref, rtol=1e-4, atol=1e-4)
    assert out_f32.shape == (N, Cout, 2 * H, 2 * W)

    # (2) Default bf16-input path (f32 accumulation), checked against a
    #     reference computed from bf16-rounded inputs.
    out_bf16 = jax.block_until_ready(
        decoder_block(x, weight, bias, stride=stride, padding=padding,
                      out_padding=out_padding, act='relu'))
    x_r = np.asarray(x.astype(jnp.bfloat16).astype(jnp.float32))
    w_r = np.asarray(weight.astype(jnp.bfloat16).astype(jnp.float32))
    ref_bf = _conv_transpose_ref(x_r, w_r, np.asarray(bias),
                                 stride, padding, out_padding)
    np.testing.assert_allclose(np.asarray(out_bf16), ref_bf,
                               rtol=2e-3, atol=2e-3)
    assert out_bf16.shape == (N, Cout, 2 * H, 2 * W)

    print("KERNEL_OK")
</pallas_src>

<mosaic_0001>
module attributes {stable_mosaic.version = 11 : i64} {
  func.func @_decoder_kernel(%arg0: i32, %arg1: memref<1x4x432xf32, #tpu.memory_space<vmem>>, %arg2: memref<32x16xf32, #tpu.memory_space<vmem>>, %arg3: memref<32x1xf32, #tpu.memory_space<vmem>>, %arg4: memref<1x32x384xf32, #tpu.memory_space<vmem>>) attributes {dimension_semantics = [#tpu.dimension_semantics<parallel>], iteration_bounds = array<i64: 2>, scalar_prefetch = 0 : i64, scratch_operands = 0 : i64, tpu.core_type = #tpu.core_type<tc>, window_params = [{transform_indices = @transform_0, window_bounds = array<i64: 1, 4, 432>}, {pipeline_mode = #tpu.pipeline_mode<synchronous>, transform_indices = @transform_1, window_bounds = array<i64: 32, 16>}, {pipeline_mode = #tpu.pipeline_mode<synchronous>, transform_indices = @transform_2, window_bounds = array<i64: 32, 1>}, {transform_indices = @transform_3, window_bounds = array<i64: 1, 32, 384>}]} {
    %c0 = arith.constant 0 : index
    %c0_0 = arith.constant 0 : index
    %c0_1 = arith.constant 0 : index
    %0 = vector.load %arg1[%c0, %c0_0, %c0_1] : memref<1x4x432xf32, #tpu.memory_space<vmem>>, vector<1x4x384xf32>
    %1 = vector.shape_cast %0 : vector<1x4x384xf32> to vector<4x384xf32>
    %c0_2 = arith.constant 0 : index
    %c0_3 = arith.constant 0 : index
    %c1 = arith.constant 1 : index
    %2 = vector.load %arg1[%c0_2, %c0_3, %c1] : memref<1x4x432xf32, #tpu.memory_space<vmem>>, vector<1x4x384xf32>
    %3 = vector.shape_cast %2 : vector<1x4x384xf32> to vector<4x384xf32>
    %c0_4 = arith.constant 0 : index
    %c0_5 = arith.constant 0 : index
    %c24 = arith.constant 24 : index
    %4 = vector.load %arg1[%c0_4, %c0_5, %c24] : memref<1x4x432xf32, #tpu.memory_space<vmem>>, vector<1x4x384xf32>
    %5 = vector.shape_cast %4 : vector<1x4x384xf32> to vector<4x384xf32>
    %c0_6 = arith.constant 0 : index
    %c0_7 = arith.constant 0 : index
    %c25 = arith.constant 25 : index
    %6 = vector.load %arg1[%c0_6, %c0_7, %c25] : memref<1x4x432xf32, #tpu.memory_space<vmem>>, vector<1x4x384xf32>
    %7 = vector.shape_cast %6 : vector<1x4x384xf32> to vector<4x384xf32>
    %8 = tpu.concatenate %1, %3, %5, %7 in 0 : vector<4x384xf32>, vector<4x384xf32>, vector<4x384xf32>, vector<4x384xf32> -> vector<16x384xf32>
    %c0_8 = arith.constant 0 : index
    %c0_9 = arith.constant 0 : index
    %9 = vector.load %arg2[%c0_8, %c0_9] : memref<32x16xf32, #tpu.memory_space<vmem>>, vector<32x16xf32>
    %cst = arith.constant dense<0.000000e+00> : vector<32x384xf32>
    %10 = tpu.matmul %9, %8, %cst {dimension_numbers = #tpu.dot_dimension_numbers<[1], [0], [0], [1], [0, 0, 1, 1], [], []>} : vector<32x16xf32>, vector<16x384xf32>, vector<32x384xf32> -> vector<32x384xf32>
    %c0_10 = arith.constant 0 : index
    %c0_11 = arith.constant 0 : index
    %11 = vector.load %arg3[%c0_10, %c0_11] : memref<32x1xf32, #tpu.memory_space<vmem>>, vector<32x1xf32>
    %12 = vector.broadcast %11 : vector<32x1xf32> to vector<32x384xf32>
    %13 = arith.addf %10, %12 : vector<32x384xf32>
    %cst_12 = arith.constant 0.000000e+00 : f32
    %14 = vector.broadcast %cst_12 : f32 to vector<32x384xf32>
    %15 = arith.maximumf %13, %14 : vector<32x384xf32>
    %c0_13 = arith.constant 0 : index
    %c0_14 = arith.constant 0 : index
    %c0_15 = arith.constant 0 : index
    %16 = vector.load %arg4[%c0_13, %c0_14, %c0_15] : memref<1x32x384xf32, #tpu.memory_space<vmem>>, vector<1x32x384xf32>
    %17 = vector.shape_cast %16 : vector<1x32x384xf32> to vector<32x384xf32>
    %18 = vector.shape_cast %15 : vector<32x384xf32> to vector<1x32x384xf32>
    tpu.vector_store %arg4[%c0_13, %c0_14, %c0_15], %18 {strides = array<i32>} : memref<1x32x384xf32, #tpu.memory_space<vmem>>, vector<1x32x384xf32>,
    return
  }
  func.func @transform_0(%arg0: i32) -> (i32, i32, i32) {
    %c0_i32 = arith.constant 0 : i32
    %c0_i32_0 = arith.constant 0 : i32
    %c0_i32_1 = arith.constant 0 : i32
    return %arg0, %c0_i32, %c0_i32_0 : i32, i32, i32
  }
  func.func @transform_1(%arg0: i32) -> (i32, i32) {
    %c0_i32 = arith.constant 0 : i32
    %c0_i32_0 = arith.constant 0 : i32
    %c0_i32_1 = arith.constant 0 : i32
    return %c0_i32, %c0_i32_0 : i32, i32
  }
  func.func @transform_2(%arg0: i32) -> (i32, i32) {
    %c0_i32 = arith.constant 0 : i32
    %c0_i32_0 = arith.constant 0 : i32
    %c0_i32_1 = arith.constant 0 : i32
    return %c0_i32, %c0_i32_0 : i32, i32
  }
  func.func @transform_3(%arg0: i32) -> (i32, i32, i32) {
    %c0_i32 = arith.constant 0 : i32
    %c0_i32_0 = arith.constant 0 : i32
    %c0_i32_1 = arith.constant 0 : i32
    return %arg0, %c0_i32, %c0_i32_0 : i32, i32, i32
  }
}

</mosaic_0001>

<bundles_post_ra>
// kernel: tpu_custom_call.1
= control target key start
LH: loop header
LB: loop body
LE: loop exit
PB: predicated region body
PF: predicated region fallthrough
CT: control target
= control target key end

     0   :  { %8 = vsyncpa [#allocation3], 0  ;;  %s940_s0 = inlined_call_operand.vmem [shape: f32[2,4,432], index: 0, kind: input, shape index: {}]   ;;  %s941_s1 = inlined_call_operand.vmem [shape: f32[32,16], index: 1, kind: input, shape index: {}]   ;;  %s942_s2 = inlined_call_operand.vmem [shape: f32[32,1], index: 2, kind: input, shape index: {}]   ;;  %s943_s3 = inlined_call_operand.hbm [shape: f32[2,32,384], index: 3, kind: output, shape index: {}]  }
   0x1   :  { %10 = vsyncpa [#allocation3 + $0x1], 0  ;;  %s761_s12 = smov 0   ;;  %s763_s13 = smov 0  }
   0x2   :  { %s765_s14 = smov 0   ;;  %s767_s15 = smov 0  }
   0x3 LB: > { %s782_s16 = sadd.s32 4294967295, %s731_s15   ;;  %s546_s17 = sadd.s32 4294967294, %s731_s15   ;;  %s731_s15 = sphi %s767_s15, %s949_s15   ;;  %s727_s14 = sphi %s765_s14, %s948_s14   ;;  %s723_s13 = sphi %s763_s13, %s947_s13   ;;  %s719_s12 = sphi %s761_s12, %s946_s12  }
   0x4   : > { %s786_s18 = sadd.s32 1, %s731_s15   ;;  %s91_s19 = sadd.s32 1, %s727_s14 }
   0x5   : > { %s88_s20 = ssub.s32 %s731_s15, %s786_s18  ;;  %p101_p0 = scmp.ne.s32.totalorder %s727_s14, %s723_s13 }
   0x6   : > { %p89_p1 = scmp.eq.s32.totalorder %s88_s20, 0  ;;  %p102_p2 = scmp.eq.s32.totalorder %s782_s16, 1 }
   0x7   : > { %p107_p3 = scmp.ne.s32.totalorder %s723_s13, %s719_s12  ;;  %p108_p4 = scmp.eq.s32.totalorder %s546_s17, 1 }
   0x8   : > { %s797_s21 = scalar_select %p89_p1, %s727_s14, %s91_s19  }
   0x9   : > { %p799_p5 = por %p102_p2, %p101_p0  ;;  %p803_p6 = por %p108_p4, %p107_p3 }
   0xa   : > { %p549_p7 = scmp.ge.s32.totalorder %s731_s15, 1  ;;  %p140_p8 = scmp.lt.s32.totalorder %s731_s15, 3 }
   0xc   : > { %p141_p9 = pnand %p549_p7, %p140_p8 }
   0xd   : > { %p164_p10 = scmp.lt.s32.totalorder (!%p141_p9), %s782_s16, 1  ;;  %s733_s29 = smov (!%p141_p9), 103   ;;  %v735_v9 = vmov (!%p141_p9), 0.0   ;;  %v235_v11 = vld [vmem:[%s942_s2] sm:$0xff] (!%p141_p9)  ;;  %v737_v12 = vmov (!%p141_p9), 0   ;;  %v236_v13 = vld [vmem:[%s942_s2 + $0x8] sm:$0xff] (!%p141_p9) }
   0xe   : > { %144 = sbr.rel (%p141_p9) target bundleno = 402 (0x192), region = 32  ;;  %s734_s30 = smov (!%p141_p9), 127   ;;  %336 = vmatprep.mubr.f32.mxu0 (!%p141_p9), %v735_v9  ;;  %354 = vmatprep.mubr.f32.mxu1 (!%p141_p9), %v735_v9  ;;  %v237_v14 = vld [vmem:[%s942_s2 + $0x10] sm:$0xff] (!%p141_p9)  ;;  %v238_v15 = vld [vmem:[%s942_s2 + $0x18] sm:$0xff] (!%p141_p9)  ;;  %vm186_vm0 = vcmask (!%p141_p9), 1039360   ;;  %vm217_vm1 = vcmask (!%p141_p9), 842752  }
   0xf   : > { %s736_s4 = smov (!%p141_p9), 104   ;;  %663 = vset.pattern.permute.xlu1 (!%p141_p9), %v737_v12  ;;  %664 = vset.pattern.permute.xlu0 (!%p141_p9), %v737_v12  ;;  %vm202_vm2 = vcmask (!%p141_p9), 850944   ;;  %vm224_vm3 = vcmask (!%p141_p9), 1043456   ;;  %v231_v52 = vld [vmem:[%s941_s1] sm:$0xff] (!%p141_p9)  ;;  %vm259_vm4 = vcmask (!%p141_p9), 130048   ;;  %v234_v53 = vld [vmem:[%s941_s1 + $0x18] sm:$0xff] (!%p141_p9) }
  0x10   : > { %v232_v54 = vld [vmem:[%s941_s1 + $0x8] sm:$0xff] (!%p141_p9)  ;;  %v233_v55 = vld [vmem:[%s941_s1 + $0x10] sm:$0xff] (!%p141_p9)  ;;  %s591_s6 = smul.u32 (!%p141_p9), 1536, %s782_s16  ;;  %s738_s17 = smov (!%p141_p9), [#allocation2]  }
  0x11   : > { %s673_s19 = sshll.u32 (!%p141_p9), %s738_s17, 4  ;;  %s674_s19 = int_to_ptr.vmem [resolvable:$false] %s673_s19 }
  0x12   : > { %s889_s9 = scalar_lea.hbm (!%p141_p9), %s943_s3, %s591_s6  ;;  %s675_s20 = scalar_lea.vmem (!%p141_p9), %s674_s19, 3072 }
  0x15   : > { %s165_s24 = scalar_select %p164_p10, %s782_s16, 1 }
  0x17   : > { %s563_s25 = sshll.u32 %s165_s24, 4 }
  0x18   : > { %s814_s28 = scalar_lea.vmem %s940_s0, %s563_s25 }
  0x19   : > { %v817_v0 = vld [vmem:[%s814_s28] sm:$0xff]  ;;  %v171_v1 = vld [vmem:[%s814_s28 + $0x8] sm:$0xff] }
  0x1a   : > { %v177_v2 = vcombine.low %v171_v1, %v171_v1  ;;  %v176_v3 = vcombine.low %v817_v0, %v817_v0  ;;  %v173_v4 = vcombine.high %v817_v0, %v817_v0  ;;  %v193_v8 = vcombine.high %v171_v1, %v171_v1  ;;  %v170_v42 = vld [vmem:[%s814_s28 + $0x8] sm:$0xf] }
  0x1c   : > { %v648_v5 = vpack.i.bf16 %v177_v2, %v817_v0  ;;  %v653_v6 = vpack.i.bf16 %v171_v1, %v176_v3  ;;  %v643_v7 = vpack.i.bf16 %v171_v1, %v173_v4  ;;  %v658_v10 = vpack.i.bf16 %v193_v8, %v817_v0 }
  0x1e   : > { %649 = vrot.lane.b32.xlu1 %v648_v5, %s733_s29  ;;  %639 = vrot.lane.b32.xlu0 %v648_v5, %s734_s30 }
  0x22   : > { %654 = vrot.lane.b32.xlu1 %v653_v6, %s734_s30  ;;  %644 = vrot.lane.b32.xlu0 %v643_v7, %s736_s4  ;;  %s161_s30 = sand.u32 1, %s723_s13  }
  0x23   : > { %s899_s10 = scalar_lea.sflag [#allocation3], %s161_s30 }
  0x26   : > { %209 = vrot.lane.b32.xlu1 %v176_v3, %s733_s29  ;;  %659 = vrot.lane.b32.xlu0 %v658_v10, %s736_s4  ;;  %s590_s4 = smul.u32 96, %s161_s30 }
  0x28   : > { %s874_s5 = scalar_lea.vmem [#allocation2], %s590_s4 }
  0x29   : > { %s484_s7 = sshll.u32 %s874_s5, 4  ;;  %s891_s7 = int_to_ptr.vmem [resolvable:$true] %s484_s7 }
  0x2a   : > { %215 = vrot.lane.b32.xlu0 %v171_v1, %s733_s29  ;;  %241 = vperm.xlu1 %663, %v235_v11   ;;  %s669_s11 = scalar_lea.vmem %s891_s7, 1536  ;;  %p676_p0 = scmp.lt.s32.totalorder %s891_s7, %s674_s19 }
  0x2b   : > { %p670_p11 = scmp.ne.s32.totalorder %s891_s7, %s669_s11  ;;  %p677_p1 = scmp.lt.s32.totalorder %s675_s20, %s669_s11 }
  0x2d   : > { %p671_p12 = pnand %p670_p11, %p799_p5  ;;  %p678_p2 = por %p677_p1, %p676_p0 }
  0x2e   : > { %246 = vperm.xlu0 %664, %v236_v13   ;;  %251 = vperm.xlu1 %663, %v237_v14  }
  0x2f   : > { %p672_p13 = pneg %p671_p12 }
  0x31   : > { %p679_p3 = pnand %p678_p2, %p672_p13 }
  0x32   : > { %256 = vperm.xlu1 %663, %v238_v15  }
  0x90   : > { %v650_v16 = vpop.permute.xlu1 %649  ;;  %v640_v17 = vpop.permute.xlu0 %639 }
  0x91   : > { %v642_v18 = vunpack.i.h.bf16 %v640_v17  ;;  %v641_v19 = vunpack.i.l.bf16 %v640_v17  ;;  %v652_v20 = vunpack.i.h.bf16 %v650_v16  ;;  %v651_v21 = vunpack.i.l.bf16 %v650_v16 }
  0x93   : > { %v188_v27 = vsel %vm186_vm0, %v641_v19, %v642_v18  ;;  %v219_v30 = vsel %vm217_vm1, %v651_v21, %v652_v20 }
  0x94   : > { %v655_v22 = vpop.permute.xlu1 %654  ;;  %v645_v23 = vpop.permute.xlu0 %644  ;;  %v226_v33 = vsel %vm224_vm3, %v173_v4, %v188_v27 }
  0x95   : > { %v656_v24 = vunpack.i.l.bf16 %v655_v22  ;;  %v647_v25 = vunpack.i.h.bf16 %v645_v23  ;;  %v646_v26 = vunpack.i.l.bf16 %v645_v23  ;;  %v657_v28 = vunpack.i.h.bf16 %v655_v22 }
  0x97   : > { %v204_v29 = vsel %vm202_vm2, %v646_v26, %v647_v25  ;;  %v187_v38 = vsel %vm186_vm0, %v656_v24, %v641_v19  ;;  %v189_v39 = vsel %vm186_vm0, %v642_v18, %v657_v28 }
  0x98   : > { %v210_v31 = vpop.permute.xlu1 %209  ;;  %v660_v32 = vpop.permute.xlu0 %659  ;;  %v229_v34 = vsel %vm224_vm3, %v204_v29, %v219_v30  ;;  %v225_v44 = vsel %vm224_vm3, %v817_v0, %v187_v38  ;;  %v227_v50 = vsel %vm224_vm3, %v170_v42, %v189_v39 }
  0x99   : > { %v662_v35 = vunpack.i.h.bf16 %v660_v32  ;;  %v661_v36 = vunpack.i.l.bf16 %v660_v32  ;;  %v580_v37 = vpack.c.bf16 %v229_v34, %v226_v33  ;;  %v218_v40 = vsel %vm217_vm1, %v210_v31, %v651_v21 }
  0x9b   : > { %581 = vmatprep.subr.bf16.mxu0 %v580_v37  ;;  %588 = vmatprep.subr.bf16.mxu1 %v580_v37  ;;  %v203_v41 = vsel %vm202_vm2, %v661_v36, %v646_v26  ;;  %v205_v46 = vsel %vm202_vm2, %v647_v25, %v662_v35 }
  0x9c   : > { %v216_v43 = vpop.permute.xlu0 %215  ;;  %v228_v45 = vsel %vm224_vm3, %v203_v41, %v218_v40 }
  0x9d   : > { %v220_v47 = vsel %vm217_vm1, %v652_v20, %v216_v43  ;;  %v582_v48 = vpack.c.bf16 %v228_v45, %v225_v44 }
  0x9e   : > { %v230_v49 = vsel %vm224_vm3, %v205_v46, %v220_v47 }
  0x9f   : > { %583 = vmatpush1.bf16.msra.mxu0 %v582_v48  ;;  %589 = vmatpush1.bf16.msra.mxu1 %v582_v48  ;;  %v584_v51 = vpack.c.bf16 %v230_v49, %v227_v50 }
  0xa1   : > { %585 = vmatprep.subr.bf16.mxu1 %v584_v51 }
  0xa2   : > { %552 = vmatmul.mubr.msk.f32.vlgmr.msra.gmra.mrb[0].mxu0 %vm259_vm4, %v231_v52  ;;  %555 = vmatmul.mubr.msk.f32.vlgmr.msra.gmra.mrb[0].mxu1 %vm259_vm4, %v234_v53 }
  0xa3   : > { %587 = vmatpush3.bf16.msra.mxu1 %v584_v51  ;;  %342 = vmatprep.mubr.f32.mxu0 %v735_v9 }
  0xa4   : > { %574 = vmatprep.mubr.msk.f32.mxu1 %vm259_vm4, %v231_v52 }
  0xa6   : > { %553 = vmatmul.mubr.msk.f32.gmra.mrb[2].mxu0 %vm259_vm4, %v232_v54  ;;  %575 = vmatmul.mubr.msk.f32.vlgmr.msra.gmra.mrb[2].mxu1 %vm259_vm4, %v232_v54 }
  0xa7   : > { %348 = vmatprep.mubr.f32.mxu0 %v735_v9  ;;  %577 = vmatprep.mubr.msk.f32.mxu1 %vm259_vm4, %v233_v55 }
  0xa9   : > { %v242_v56 = vpop.permute.xlu1 %241 }
  0xaa   : > { %554 = vmatmul.mubr.msk.f32.gmra.mrb[4].mxu0 %vm259_vm4, %v233_v55  ;;  %578 = vmatmul.mubr.msk.f32.gmra.mrb[4].mxu1 %vm259_vm4, %v234_v53 }
  0xad   : > { %v252_v57 = vpop.permute.xlu1 %251  ;;  %v247_v3 = vpop.permute.xlu0 %246 }
  0xb1   : > { %v257_v58 = vpop.permute.xlu1 %256 }
 0x175   : > { %v338_v59 = vpop.f32.mrb[0].mxu0  ;;  %v356_v60 = vpop.f32.mrb[0].mxu1 }
 0x176   : > { %v339_v61 = vadd.f32 %v338_v59, %v242_v56  ;;  %v357_v62 = vadd.f32 %v356_v60, %v257_v58  ;;  %v340_v63 = vpop.f32.mrb[1].mxu0  ;;  %v358_v0 = vpop.f32.mrb[1].mxu1 }
 0x177   : > { %v341_v1 = vadd.f32 %v340_v63, %v242_v56  ;;  %v359_v2 = vadd.f32 %v358_v0, %v257_v58 }
 0x178   : > { %v446_v4 = vmax.f32 %v339_v61, 0.0  ;;  %v455_v5 = vmax.f32 %v357_v62, 0.0 }
 0x179   : > { %v447_v6 = vmax.f32 %v341_v1, 0.0  ;;  %v456_v7 = vmax.f32 %v359_v2, 0.0  ;;  %v344_v8 = vpop.f32.mrb[2].mxu0  ;;  %v576_v9 = vpop.f32.mrb[2].mxu1 }
 0x17a   : > { %458 = vst [vmem:[%s874_s5] sm:$0xff] %v446_v4  ;;  %467 = vst [vmem:[%s874_s5 + $0x48] sm:$0xff] %v455_v5  ;;  %v345_v10 = vadd.f32 %v344_v8, %v247_v3  ;;  %v433_v11 = vadd.f32 %v576_v9, %v247_v3  ;;  %v346_v12 = vpop.f32.mrb[3].mxu0  ;;  %v427_v13 = vpop.f32.mrb[3].mxu1 }
 0x17b   : > { %459 = vst [vmem:[%s874_s5 + $0x8] sm:$0xff] %v447_v6  ;;  %468 = vst [vmem:[%s874_s5 + $0x50] sm:$0xff] %v456_v7  ;;  %v347_v14 = vadd.f32 %v346_v12, %v247_v3  ;;  %v428_v15 = vadd.f32 %v427_v13, %v242_v56 }
 0x17c   : > { %v449_v16 = vmax.f32 %v345_v10, 0.0  ;;  %v451_v17 = vmax.f32 %v433_v11, 0.0 }
 0x17d   : > { %v450_v18 = vmax.f32 %v347_v14, 0.0  ;;  %v448_v19 = vmax.f32 %v428_v15, 0.0  ;;  %v350_v20 = vpop.f32.mrb[4].mxu0  ;;  %v579_v21 = vpop.f32.mrb[4].mxu1 }
 0x17e   : > { %461 = vst [vmem:[%s874_s5 + $0x18] sm:$0xff] %v449_v16  ;;  %463 = vst [vmem:[%s874_s5 + $0x28] sm:$0xff] %v451_v17  ;;  %v351_v22 = vadd.f32 %v350_v20, %v252_v57  ;;  %v443_v23 = vadd.f32 %v579_v21, %v257_v58  ;;  %v352_v24 = vpop.f32.mrb[5].mxu0  ;;  %v437_v25 = vpop.f32.mrb[5].mxu1 }
 0x17f   : > { %462 = vst [vmem:[%s874_s5 + $0x20] sm:$0xff] %v450_v18  ;;  %460 = vst [vmem:[%s874_s5 + $0x10] sm:$0xff] %v448_v19  ;;  %v353_v26 = vadd.f32 %v352_v24, %v252_v57  ;;  %v438_v27 = vadd.f32 %v437_v25, %v252_v57 }
 0x180   : > { %v452_v28 = vmax.f32 %v351_v22, 0.0  ;;  %v457_v29 = vmax.f32 %v443_v23, 0.0 }
 0x181   : > { %v453_v30 = vmax.f32 %v353_v26, 0.0  ;;  %v454_v31 = vmax.f32 %v438_v27, 0.0 }
 0x182   : > { %464 = vst [vmem:[%s874_s5 + $0x30] sm:$0xff] %v452_v28  ;;  %469 = vst [vmem:[%s874_s5 + $0x58] sm:$0xff] %v457_v29 }
 0x183   : > { %465 = vst [vmem:[%s874_s5 + $0x38] sm:$0xff] %v453_v30  ;;  %466 = vst [vmem:[%s874_s5 + $0x40] sm:$0xff] %v454_v31 }
 0x184   : > { %682 = shalt.err (!%p679_p3)
}
 0x185   : > { %s683_s24 = scalar_lea.hbm %s889_s9, 1536  ;;  %s687_s27 = scalar_lea.hbm %s943_s3, 3072 }
 0x186   : > { %p684_p4 = scmp.ne.s32.totalorder %s889_s9, %s683_s24  ;;  %p688_p9 = scmp.lt.u32.totalorder %s889_s9, %s943_s3 }
 0x187   : > { %p689_p10 = scmp.lt.u32.totalorder %s687_s27, %s683_s24  ;;  %p691_p12 = scmp.lt.u32.totalorder %s683_s24, %s889_s9 }
 0x188   : > { %p685_p7 = pnand %p684_p4, %p799_p5 }
 0x189   : > { %p690_p11 = por %p689_p10, %p688_p9 }
 0x18a   : > { %p686_p8 = pneg %p685_p7 }
 0x18b   : > { %p692_p13 = por %p691_p12, %p690_p11 }
 0x18d   : > { %p693_p0 = pnand %p692_p13, %p686_p8 }
 0x18f   : > { %696 = shalt.err (!%p693_p0)
}
 0x190   : > { %s739_s30 = smov 384   ;;  %s740_s4 = smov 24  }
 0x191   : > { %592 = dma.vmem_to_hbm [thread:$0]  (%p799_p5), %s891_s7, 1536, %s889_s9, %s899_s10, %s739_s30, %s739_s30, %s740_s4  }
 0x192 PF: > { %p598_p1 = scmp.ge.s32.totalorder %s731_s15, 2  ;;  %s499_s5 = sand.u32 1, %s719_s12  }
 0x193   : > { %s500_s6 = scalar_lea.sflag [#allocation3], %s499_s5 }
 0x194   : > { %p595_p2 = pnand %p598_p1, %p803_p6 }
 0x196   : > { %714 = dma.done.wait (!%p595_p2), %s500_s6, 1536  }
 0x197   : > { %716 = vsyncadd (!%p595_p2), %s500_s6, 4294965760  ;;  %p13_p3 = scmp.ge.s32.totalorder %s786_s18, 4   ;;  %s946_s12 = smov %s723_s13 }
 0x198   : > { %s947_s13 = smov %s727_s14  ;;  %s948_s14 = smov %s797_s21 }
 0x199   : > { %s949_s15 = smov %s786_s18  ;;  %15 = sbr.rel (!%p13_p3) target bundleno = 3 (0x3), region = 67 }
 0x1a0   :  { %505 = vsyncpa [#allocation3], 1 }
 0x1a1   :  { %507 = vsyncpa [#allocation3 + $0x1], 1 }

</bundles_post_ra>
